<compile_context>
chip_gen: v6e
topology: v6e:2x2x1
jax: 0.10.0
libtpu: 0.0.40
codegen_flags: <defaults>
</compile_context>

<pallas_src>
import jax
import jax.numpy as jnp
from jax.experimental import pallas as pl
from jax.experimental.pallas import tpu as pltpu

HIDDEN = 32
LANE = 128


def shallow_mlp_kernel(xT_ref, w1_ref, b1_ref, w2_ref, b2_ref, w3_ref, b3_ref, oT_ref):
    """Fused 3-layer MLP forward on one batch tile, feature-major layout.

    xT_ref: (in_dim, TB)              -- batch in lanes
    w1_ref: (32, in_dim)   b1_ref: (32, 1)      (f32 biases)
    w2_ref: (32, 32)       b2_ref: (32, 1)
    w3_ref: (out_dim, 32)  b3_ref: (out_dim, 1)
    oT_ref: (out_dim, TB)  (f32)
    """
    x = xT_ref[...]

    # Layer 1: (32, in_dim) @ (in_dim, TB) -> (32, TB), f32 accumulate on the MXU.
    h1 = jnp.dot(w1_ref[...], x, preferred_element_type=jnp.float32) + b1_ref[...]
    h1 = jnp.maximum(h1, 0.0)

    # Layer 2: (32, 32) @ (32, TB) -> (32, TB)
    h2 = jnp.dot(w2_ref[...], h1.astype(w2_ref.dtype),
                 preferred_element_type=jnp.float32) + b2_ref[...]
    h2 = jnp.maximum(h2, 0.0)

    # Layer 3: (out_dim, 32) @ (32, TB) -> (out_dim, TB)
    out = jnp.dot(w3_ref[...], h2.astype(w3_ref.dtype),
                  preferred_element_type=jnp.float32) + b3_ref[...]
    oT_ref[...] = out.astype(oT_ref.dtype)


def shallow_network_forward(x, params, *, batch_tile=512, compute_dtype=jnp.float32):
    """Runs the fused MLP kernel.

    x: (B, in_dim) float32.
    params: (w1, b1, w2, b2, w3, b3) with w_i in PyTorch (out_features, in_features)
            layout and b_i of shape (out_features, 1), all float32.
    compute_dtype: dtype for x and the weights inside the kernel (f32 or bf16);
                   accumulation, bias-add and ReLU are always f32.
    Returns (B, out_dim) float32.
    """
    w1, b1, w2, b2, w3, b3 = params
    B, in_dim = x.shape
    out_dim = w3.shape[0]

    # --- batch tiling: always pad to a 128-lane multiple for unmasked stores -------------
    assert batch_tile % LANE == 0, "batch_tile must be a multiple of 128"
    b_pad = pl.cdiv(B, LANE) * LANE
    tile = min(batch_tile, b_pad)
    grid = (b_pad // tile,)

    # --- feature-major inputs (batch in lanes) --------------------------------------------
    xT = x.T.astype(compute_dtype)                          # (in_dim, B)
    if b_pad != B:
        xT = jnp.pad(xT, ((0, 0), (0, b_pad - B)))          # (in_dim, b_pad)

    w1c = w1.astype(compute_dtype)
    w2c = w2.astype(compute_dtype)
    w3c = w3.astype(compute_dtype)
    # biases stay f32 (added to the f32 accumulator)

    itemsize = jnp.dtype(compute_dtype).itemsize
    flops = 2 * b_pad * (in_dim * HIDDEN + HIDDEN * HIDDEN + HIDDEN * out_dim)
    bytes_accessed = (
        xT.size * itemsize
        + (w1c.size + w2c.size + w3c.size) * itemsize
        + (b1.size + b2.size + b3.size) * 4
        + b_pad * out_dim * 4
    )

    # Constant index maps -> weights/biases stay VMEM-resident across the grid.
    full = lambda shape: pl.BlockSpec(shape, lambda i: (0, 0))

    oT = pl.pallas_call(
        shallow_mlp_kernel,
        out_shape=jax.ShapeDtypeStruct((out_dim, b_pad), jnp.float32),
        grid_spec=pltpu.PrefetchScalarGridSpec(
            num_scalar_prefetch=0,
            grid=grid,
            in_specs=[
                pl.BlockSpec((in_dim, tile), lambda i: (0, i)),   # xT: batch tiled in lanes
                full(w1c.shape), full(b1.shape),
                full(w2c.shape), full(b2.shape),
                full(w3c.shape), full(b3.shape),
            ],
            out_specs=pl.BlockSpec((out_dim, tile), lambda i: (0, i)),
        ),
        compiler_params=pltpu.CompilerParams(
            dimension_semantics=("parallel",),
        ),
        cost_estimate=pl.CostEstimate(
            flops=flops, transcendentals=0, bytes_accessed=bytes_accessed),
    )(xT, w1c, b1, w2c, b2, w3c, b3)

    return oT[:, :B].T                                       # (B, out_dim) f32


def init_params(key, in_dim, out_dim):
    """Deterministic init mimicking nn.Linear's uniform(-1/sqrt(fan_in), 1/sqrt(fan_in)).

    Weights use PyTorch's (out_features, in_features) layout; biases are (out_features, 1).
    """
    ks = jax.random.split(key, 6)

    def lin(kw, kb, fan_in, fan_out):
        bound = 1.0 / jnp.sqrt(float(fan_in))
        w = jax.random.uniform(kw, (fan_out, fan_in), jnp.float32, -bound, bound)
        b = jax.random.uniform(kb, (fan_out, 1), jnp.float32, -bound, bound)
        return w, b

    w1, b1 = lin(ks[0], ks[1], in_dim, HIDDEN)
    w2, b2 = lin(ks[2], ks[3], HIDDEN, HIDDEN)
    w3, b3 = lin(ks[4], ks[5], HIDDEN, out_dim)
    return (w1, b1, w2, b2, w3, b3)


def reference_forward(x, params):
    w1, b1, w2, b2, w3, b3 = params
    h1 = jnp.maximum(x @ w1.T + b1.T, 0.0)
    h2 = jnp.maximum(h1 @ w2.T + b2.T, 0.0)
    return h2 @ w3.T + b3.T


if __name__ == "__main__":
    key = jax.random.PRNGKey(0)
    k_param, k_x, k_x2 = jax.random.split(key, 3)

    in_dim, out_dim = 16, 4
    params = init_params(k_param, in_dim, out_dim)

    # 1) Small-shape check (single grid step, padded to one 128-lane tile, f32 path).
    batch = 8
    x = jax.random.normal(k_x, (batch, in_dim), dtype=jnp.float32)
    out = jax.block_until_ready(shallow_network_forward(x, params))
    ref = reference_forward(x, params)
    assert out.shape == (batch, out_dim)
    assert jnp.allclose(out, ref, atol=1e-5, rtol=1e-5), "f32 small-batch mismatch"

    # 2) Tiled path (grid > 1: pipelined DMA / megacore sharding), f32.
    batch2 = 256
    x2 = jax.random.normal(k_x2, (batch2, in_dim), dtype=jnp.float32)
    out2 = jax.block_until_ready(
        shallow_network_forward(x2, params, batch_tile=128))
    ref2 = reference_forward(x2, params)
    assert out2.shape == (batch2, out_dim)
    assert jnp.allclose(out2, ref2, atol=1e-5, rtol=1e-5), "f32 tiled-batch mismatch"

    # 3) bf16 weights/activations (halved HBM traffic for the x stream), f32 accumulate.
    out3 = jax.block_until_ready(
        shallow_network_forward(x2, params, batch_tile=128, compute_dtype=jnp.bfloat16))
    assert out3.shape == (batch2, out_dim)
    assert jnp.allclose(out3, ref2, atol=5e-2, rtol=5e-2), "bf16 tiled-batch mismatch"

    print("KERNEL_OK")
</pallas_src>

<mosaic_0001>
module attributes {stable_mosaic.version = 11 : i64} {
  func.func @shallow_mlp_kernel(%arg0: i32, %arg1: memref<16x128xf32, #tpu.memory_space<vmem>>, %arg2: memref<32x16xf32, #tpu.memory_space<vmem>>, %arg3: memref<32x1xf32, #tpu.memory_space<vmem>>, %arg4: memref<32x32xf32, #tpu.memory_space<vmem>>, %arg5: memref<32x1xf32, #tpu.memory_space<vmem>>, %arg6: memref<4x32xf32, #tpu.memory_space<vmem>>, %arg7: memref<4x1xf32, #tpu.memory_space<vmem>>, %arg8: memref<4x128xf32, #tpu.memory_space<vmem>>) attributes {dimension_semantics = [#tpu.dimension_semantics<parallel>], iteration_bounds = array<i64: 1>, scalar_prefetch = 0 : i64, scratch_operands = 0 : i64, tpu.core_type = #tpu.core_type<tc>, window_params = [{transform_indices = @transform_0, window_bounds = array<i64: 16, 128>}, {pipeline_mode = #tpu.pipeline_mode<synchronous>, transform_indices = @transform_1, window_bounds = array<i64: 32, 16>}, {pipeline_mode = #tpu.pipeline_mode<synchronous>, transform_indices = @transform_2, window_bounds = array<i64: 32, 1>}, {pipeline_mode = #tpu.pipeline_mode<synchronous>, transform_indices = @transform_3, window_bounds = array<i64: 32, 32>}, {pipeline_mode = #tpu.pipeline_mode<synchronous>, transform_indices = @transform_4, window_bounds = array<i64: 32, 1>}, {pipeline_mode = #tpu.pipeline_mode<synchronous>, transform_indices = @transform_5, window_bounds = array<i64: 4, 32>}, {pipeline_mode = #tpu.pipeline_mode<synchronous>, transform_indices = @transform_6, window_bounds = array<i64: 4, 1>}, {transform_indices = @transform_7, window_bounds = array<i64: 4, 128>}]} {
    %c0 = arith.constant 0 : index
    %c0_0 = arith.constant 0 : index
    %0 = vector.load %arg1[%c0, %c0_0] : memref<16x128xf32, #tpu.memory_space<vmem>>, vector<16x128xf32>
    %c0_1 = arith.constant 0 : index
    %c0_2 = arith.constant 0 : index
    %1 = vector.load %arg2[%c0_1, %c0_2] : memref<32x16xf32, #tpu.memory_space<vmem>>, vector<32x16xf32>
    %cst = arith.constant dense<0.000000e+00> : vector<32x128xf32>
    %2 = tpu.matmul %1, %0, %cst {dimension_numbers = #tpu.dot_dimension_numbers<[1], [0], [0], [1], [0, 0, 1, 1], [], []>} : vector<32x16xf32>, vector<16x128xf32>, vector<32x128xf32> -> vector<32x128xf32>
    %c0_3 = arith.constant 0 : index
    %c0_4 = arith.constant 0 : index
    %3 = vector.load %arg3[%c0_3, %c0_4] : memref<32x1xf32, #tpu.memory_space<vmem>>, vector<32x1xf32>
    %4 = vector.broadcast %3 : vector<32x1xf32> to vector<32x128xf32>
    %5 = arith.addf %2, %4 : vector<32x128xf32>
    %cst_5 = arith.constant 0.000000e+00 : f32
    %6 = vector.broadcast %cst_5 : f32 to vector<32x128xf32>
    %7 = arith.maximumf %5, %6 : vector<32x128xf32>
    %c0_6 = arith.constant 0 : index
    %c0_7 = arith.constant 0 : index
    %8 = vector.load %arg4[%c0_6, %c0_7] : memref<32x32xf32, #tpu.memory_space<vmem>>, vector<32x32xf32>
    %cst_8 = arith.constant dense<0.000000e+00> : vector<32x128xf32>
    %9 = tpu.matmul %8, %7, %cst_8 {dimension_numbers = #tpu.dot_dimension_numbers<[1], [0], [0], [1], [0, 0, 1, 1], [], []>} : vector<32x32xf32>, vector<32x128xf32>, vector<32x128xf32> -> vector<32x128xf32>
    %c0_9 = arith.constant 0 : index
    %c0_10 = arith.constant 0 : index
    %10 = vector.load %arg5[%c0_9, %c0_10] : memref<32x1xf32, #tpu.memory_space<vmem>>, vector<32x1xf32>
    %11 = vector.broadcast %10 : vector<32x1xf32> to vector<32x128xf32>
    %12 = arith.addf %9, %11 : vector<32x128xf32>
    %cst_11 = arith.constant 0.000000e+00 : f32
    %13 = vector.broadcast %cst_11 : f32 to vector<32x128xf32>
    %14 = arith.maximumf %12, %13 : vector<32x128xf32>
    %c0_12 = arith.constant 0 : index
    %c0_13 = arith.constant 0 : index
    %15 = vector.load %arg6[%c0_12, %c0_13] : memref<4x32xf32, #tpu.memory_space<vmem>>, vector<4x32xf32>
    %cst_14 = arith.constant dense<0.000000e+00> : vector<4x128xf32>
    %16 = tpu.matmul %15, %14, %cst_14 {dimension_numbers = #tpu.dot_dimension_numbers<[1], [0], [0], [1], [0, 0, 1, 1], [], []>} : vector<4x32xf32>, vector<32x128xf32>, vector<4x128xf32> -> vector<4x128xf32>
    %c0_15 = arith.constant 0 : index
    %c0_16 = arith.constant 0 : index
    %17 = vector.load %arg7[%c0_15, %c0_16] : memref<4x1xf32, #tpu.memory_space<vmem>>, vector<4x1xf32>
    %18 = vector.broadcast %17 : vector<4x1xf32> to vector<4x128xf32>
    %19 = arith.addf %16, %18 : vector<4x128xf32>
    %c0_17 = arith.constant 0 : index
    %c0_18 = arith.constant 0 : index
    %20 = vector.load %arg8[%c0_17, %c0_18] : memref<4x128xf32, #tpu.memory_space<vmem>>, vector<4x128xf32>
    tpu.vector_store %arg8[%c0_17, %c0_18], %19 {strides = array<i32>} : memref<4x128xf32, #tpu.memory_space<vmem>>, vector<4x128xf32>,
    return
  }
  func.func @transform_0(%arg0: i32) -> (i32, i32) {
    %c0_i32 = arith.constant 0 : i32
    %c0_i32_0 = arith.constant 0 : i32
    return %c0_i32, %arg0 : i32, i32
  }
  func.func @transform_1(%arg0: i32) -> (i32, i32) {
    %c0_i32 = arith.constant 0 : i32
    %c0_i32_0 = arith.constant 0 : i32
    %c0_i32_1 = arith.constant 0 : i32
    return %c0_i32, %c0_i32_0 : i32, i32
  }
  func.func @transform_2(%arg0: i32) -> (i32, i32) {
    %c0_i32 = arith.constant 0 : i32
    %c0_i32_0 = arith.constant 0 : i32
    %c0_i32_1 = arith.constant 0 : i32
    return %c0_i32, %c0_i32_0 : i32, i32
  }
  func.func @transform_3(%arg0: i32) -> (i32, i32) {
    %c0_i32 = arith.constant 0 : i32
    %c0_i32_0 = arith.constant 0 : i32
    %c0_i32_1 = arith.constant 0 : i32
    return %c0_i32, %c0_i32_0 : i32, i32
  }
  func.func @transform_4(%arg0: i32) -> (i32, i32) {
    %c0_i32 = arith.constant 0 : i32
    %c0_i32_0 = arith.constant 0 : i32
    %c0_i32_1 = arith.constant 0 : i32
    return %c0_i32, %c0_i32_0 : i32, i32
  }
  func.func @transform_5(%arg0: i32) -> (i32, i32) {
    %c0_i32 = arith.constant 0 : i32
    %c0_i32_0 = arith.constant 0 : i32
    %c0_i32_1 = arith.constant 0 : i32
    return %c0_i32, %c0_i32_0 : i32, i32
  }
  func.func @transform_6(%arg0: i32) -> (i32, i32) {
    %c0_i32 = arith.constant 0 : i32
    %c0_i32_0 = arith.constant 0 : i32
    %c0_i32_1 = arith.constant 0 : i32
    return %c0_i32, %c0_i32_0 : i32, i32
  }
  func.func @transform_7(%arg0: i32) -> (i32, i32) {
    %c0_i32 = arith.constant 0 : i32
    %c0_i32_0 = arith.constant 0 : i32
    return %c0_i32, %arg0 : i32, i32
  }
}

</mosaic_0001>

<bundles_post_ra>
// kernel: tpu_custom_call.1
= control target key start
LH: loop header
LB: loop body
LE: loop exit
PB: predicated region body
PF: predicated region fallthrough
CT: control target
= control target key end

     0   :  { %vm57_vm0 = vcmask 130048   ;;  %v475_v4 = vmov 0   ;;  %s591_s0 = inlined_call_operand.vmem [shape: f32[16,128], index: 0, kind: input, shape index: {}]   ;;  %s592_s1 = inlined_call_operand.vmem [shape: f32[32,16], index: 1, kind: input, shape index: {}]   ;;  %s593_s2 = inlined_call_operand.vmem [shape: f32[32,1], index: 2, kind: input, shape index: {}]   ;;  %s594_s3 = inlined_call_operand.vmem [shape: f32[32,32], index: 3, kind: input, shape index: {}]   ;;  %s595_s4 = inlined_call_operand.vmem [shape: f32[32,1], index: 4, kind: input, shape index: {}]   ;;  %s596_s5 = inlined_call_operand.vmem [shape: f32[4,32], index: 5, kind: input, shape index: {}]   ;;  %s597_s6 = inlined_call_operand.vmem [shape: f32[4,1], index: 6, kind: input, shape index: {}]   ;;  %s598_s7 = inlined_call_operand.hbm [shape: f32[4,128], index: 7, kind: output, shape index: {}]  }
   0x1   :  { %v28_v0 = vld [vmem:[%s591_s0 + $0x8] sm:$0xff]  ;;  %v27_v1 = vld [vmem:[%s591_s0] sm:$0xff]  ;;  %451 = vset.pattern.permute.xlu0 %v475_v4  ;;  %v36_v5 = vld [vmem:[%s593_s2 + $0x18] sm:$0xff]  ;;  %452 = vset.pattern.permute.xlu1 %v475_v4 }
   0x2   :  { %v29_v2 = vld [vmem:[%s592_s1] sm:$0xff]  ;;  %412 = vmatprep.subr.mxu0 %v28_v0  ;;  %v30_v3 = vld [vmem:[%s592_s1 + $0x8] sm:$0xff]  ;;  %v31_v6 = vld [vmem:[%s592_s1 + $0x10] sm:$0xff]  ;;  %54 = vperm.xlu0 %451, %v36_v5  }
   0x3   :  { %416 = vmatprep.mubr.msk.f32.mxu0 %vm57_vm0, %v29_v2  ;;  %413 = vmatpush3.msra.mxu0 %v28_v0  ;;  %v34_v7 = vld [vmem:[%s593_s2 + $0x8] sm:$0xff]  ;;  %v35_v8 = vld [vmem:[%s593_s2 + $0x10] sm:$0xff] }
   0x4   :  { %414 = vmatprep.subr.mxu0 %v27_v1  ;;  %44 = vperm.xlu1 %452, %v34_v7  }
   0x5   :  { %415 = vmatpush3.msra.mxu0 %v27_v1 }
   0x6   :  { %417 = vmatmul.mubr.msk.f32.vlgmr.msra.gmra.mxu0 %vm57_vm0, %v30_v3 }
   0x7   :  { %12 = vsyncpa [#allocation3], 0  ;;  %419 = vmatprep.mubr.msk.f32.mxu0 %vm57_vm0, %v31_v6  ;;  %v32_v9 = vld [vmem:[%s592_s1 + $0x18] sm:$0xff]  ;;  %v33_v10 = vld [vmem:[%s593_s2] sm:$0xff]  ;;  %49 = vperm.xlu0 %451, %v35_v8   ;;  %vm187_vm1 = vcmask 261120   ;;  %v476_v36 = vmov 0.0  }
   0x8   :  { %v166_v11 = vld [vmem:[%s595_s4 + $0x18] sm:$0xff]  ;;  %39 = vperm.xlu1 %452, %v33_v10   ;;  %v165_v12 = vld [vmem:[%s595_s4 + $0x10] sm:$0xff]  ;;  %v164_v13 = vld [vmem:[%s595_s4 + $0x8] sm:$0xff]  ;;  %436 = vmatprep.subr.mxu0 %v476_v36  ;;  %vm477_vm2 = vmmov 0   ;;  %s478_s11 = smov [#allocation2]  }
   0x9   :  { %v163_v14 = vld [vmem:[%s595_s4] sm:$0xff]  ;;  %v160_v33 = vld [vmem:[%s594_s3 + $0x8] sm:$0xff]  ;;  %v161_v34 = vld [vmem:[%s594_s3 + $0x10] sm:$0xff]  ;;  %s376_s12 = sshll.u32 %s478_s11, 4  ;;  %s377_s12 = int_to_ptr.vmem [resolvable:$true] %s376_s12 }
   0xa   :  { %420 = vmatmul.mubr.msk.f32.gmra.mxu0 %vm57_vm0, %v32_v9  ;;  %v290_v15 = vld [vmem:[%s597_s6] sm:$0xf]  ;;  %v162_v35 = vld [vmem:[%s594_s3 + $0x18] sm:$0xff]  ;;  %s453_s13 = scalar_lea.vmem %s377_s12, 64  ;;  %p458_p1 = scmp.lt.s32.totalorder %s377_s12, %s377_s12 }
   0xb   :  { %184 = vperm.xlu0 %451, %v166_v11   ;;  %v159_v16 = vld [vmem:[%s594_s3] sm:$0xff]  ;;  %444 = vmatprep.mubr.msk.f32.mxu0 %vm477_vm2, %v476_v36  ;;  %p454_p0 = scmp.ne.s32.totalorder %s377_s12, %s453_s13  ;;  %p459_p2 = scmp.lt.s32.totalorder %s453_s13, %s453_s13 }
   0xc   :  { %179 = vperm.xlu1 %452, %v165_v12   ;;  %430 = vmatprep.mubr.msk.f32.mxu1 %vm187_vm1, %v159_v16  ;;  %v289_v53 = vld [vmem:[%s596_s5] sm:$0xf] }
   0xd   :  { %p460_p3 = por %p459_p2, %p458_p1 }
   0xf   :  { %174 = vperm.xlu0 %451, %v164_v13   ;;  %p461_p4 = pnand %p460_p3, %p454_p0 }
  0x10   :  { %169 = vperm.xlu1 %452, %v163_v14  }
  0x13   :  { %293 = vperm.xlu0 %451, %v290_v15  }
  0x7d   :  { %v55_v17 = vpop.permute.xlu0 %54 }
  0x7f   :  { %v45_v19 = vpop.permute.xlu1 %44 }
  0x82   :  { %v50_v23 = vpop.permute.xlu0 %49 }
  0x83   :  { %v40_v28 = vpop.permute.xlu1 %39 }
  0x86   :  { %v185_v37 = vpop.permute.xlu0 %184 }
  0x87   :  { %v180_v39 = vpop.permute.xlu1 %179 }
  0x8a   :  { %v175_v43 = vpop.permute.xlu0 %174 }
  0x8b   :  { %v170_v48 = vpop.permute.xlu1 %169 }
  0x8e   :  { %v294_v54 = vpop.permute.xlu0 %293 }
  0xc6   :  { %v418_v18 = vpop.f32.mrf.mxu0 }
  0xc7   :  { %v142_v25 = vadd.f32 %v418_v18, %v45_v19 }
  0xc8   :  { %v136_v20 = vpop.f32.mrf.mxu0 }
  0xc9   :  { %v137_v29 = vadd.f32 %v136_v20, %v40_v28  ;;  %v156_v31 = vmax.f32 %v142_v25, 0.0 }
  0xca   :  { %v421_v21 = vpop.f32.mrf.mxu0 }
  0xcb   :  { %v152_v22 = vadd.f32 %v421_v21, %v55_v17  ;;  %v155_v32 = vmax.f32 %v137_v29, 0.0 }
  0xcc   :  { %v146_v24 = vpop.f32.mrf.mxu0 }
  0xcd   :  { %v158_v26 = vmax.f32 %v152_v22, 0.0  ;;  %v147_v27 = vadd.f32 %v146_v24, %v50_v23 }
  0xcf   :  { %v157_v30 = vmax.f32 %v147_v27, 0.0  ;;  %422 = vmatprep.subr.mxu1 %v158_v26 }
  0xd0   :  { %423 = vmatpush3.msra.mxu1 %v158_v26 }
  0xd1   :  { %424 = vmatprep.subr.mxu1 %v157_v30 }
  0xd2   :  { %425 = vmatpush3.msra.mxu1 %v157_v30 }
  0xd3   :  { %426 = vmatprep.subr.mxu1 %v156_v31 }
  0xd4   :  { %427 = vmatpush3.msra.mxu1 %v156_v31 }
  0xd5   :  { %428 = vmatprep.subr.mxu1 %v155_v32 }
  0xd6   :  { %429 = vmatpush3.msra.mxu1 %v155_v32 }
  0xd7   :  { %431 = vmatmul.mubr.msk.f32.vlgmr.msra.gmra.mxu1 %vm187_vm1, %v160_v33 }
  0xd8   :  { %433 = vmatprep.mubr.msk.f32.mxu1 %vm187_vm1, %v161_v34 }
  0xdb   :  { %434 = vmatmul.mubr.msk.f32.gmra.mxu1 %vm187_vm1, %v162_v35 }
 0x197   :  { %v432_v38 = vpop.f32.mrf.mxu1 }
 0x198   :  { %v272_v45 = vadd.f32 %v432_v38, %v175_v43 }
 0x199   :  { %v266_v40 = vpop.f32.mrf.mxu1 }
 0x19a   :  { %v267_v49 = vadd.f32 %v266_v40, %v170_v48  ;;  %v286_v51 = vmax.f32 %v272_v45, 0.0 }
 0x19b   :  { %v435_v41 = vpop.f32.mrf.mxu1 }
 0x19c   :  { %v282_v42 = vadd.f32 %v435_v41, %v185_v37  ;;  %v285_v52 = vmax.f32 %v267_v49, 0.0 }
 0x19d   :  { %v276_v44 = vpop.f32.mrf.mxu1 }
 0x19e   :  { %v288_v46 = vmax.f32 %v282_v42, 0.0  ;;  %v277_v47 = vadd.f32 %v276_v44, %v180_v39 }
 0x1a0   :  { %v287_v50 = vmax.f32 %v277_v47, 0.0  ;;  %437 = vmatpush3.msra.mxu0 %v288_v46 }
 0x1a1   :  { %438 = vmatprep.subr.mxu0 %v476_v36 }
 0x1a2   :  { %439 = vmatpush3.msra.mxu0 %v287_v50 }
 0x1a3   :  { %440 = vmatprep.subr.mxu0 %v476_v36 }
 0x1a4   :  { %441 = vmatpush3.msra.mxu0 %v286_v51 }
 0x1a5   :  { %442 = vmatprep.subr.mxu0 %v476_v36 }
 0x1a6   :  { %443 = vmatpush3.msra.mxu0 %v285_v52 }
 0x1a7   :  { %445 = vmatmul.mubr.msk.f32.vlgmr.msra.gmra.mxu0 %vm187_vm1, %v289_v53 }
 0x267   :  { %v365_v55 = vpop.f32.mrf.mxu0 }
 0x268   :  { %v366_v56 = vadd.f32 %v365_v55, %v294_v54 }
 0x269   :  { %v446_v57 = vpop.f32.mrf.mxu0 }
 0x26a   :  { %369 = vst [vmem:[#allocation2] sm:$0xf] %v366_v56 }
 0x26b   :  { %464 = shalt.err (!%p461_p4)
}
 0x26c   :  { %379 = dma.vmem_to_hbm [thread:$0]  %s377_s12, 64, %s598_s7, [#allocation3]  }
 0x26d   :  { %473 = dma.done.wait [#allocation3], 64  }
 0x26e   :  { %474 = vsyncadd [#allocation3], 4294967232 }
 0x26f   :  { %383 = vsyncpa [#allocation3], 1 }

</bundles_post_ra>
